<compile_context>
chip_gen: v6e
topology: v6e:2x2x1
jax: 0.10.0
libtpu: 0.0.40
codegen_flags: <defaults>
</compile_context>

<pallas_src>
import jax
import jax.numpy as jnp
from jax.experimental import pallas as pl
from jax.experimental.pallas import tpu as pltpu


def _round_up(x, m):
    return (x + m - 1) // m * m


def critic_kernel(sa_ref, w1_ref, b1_ref, w2_ref, b2_ref, w3_ref, b3_ref,
                  wq_ref, bq_ref, q_ref):
    # Feature-major: everything is (features, TILE_B); batch on lanes.
    sa = sa_ref[...]                                                   # (F, TB)

    # Layer 1 (fused state/action branches via block-diagonal weight):
    # rows 0:32  == relu(W_x1 @ state  + b_x1)
    # rows 32:64 == relu(W_a1 @ action + b_a1)   (== cat([x, a]) transposed)
    h = jnp.dot(w1_ref[...], sa, preferred_element_type=jnp.float32)
    h = jnp.maximum(h + b1_ref[...], 0.0)                              # (64, TB)

    # Layer 2: relu(W_h2 @ cat([x, a]) + b_h2)
    h = jnp.dot(w2_ref[...], h, preferred_element_type=jnp.float32)
    h = jnp.maximum(h + b2_ref[...], 0.0)                              # (32, TB)

    # Layer 3: relu(W_h3 @ h + b_h3)
    h = jnp.dot(w3_ref[...], h, preferred_element_type=jnp.float32)
    h = jnp.maximum(h + b3_ref[...], 0.0)                              # (16, TB)

    # Output layer: W_q @ h + b_q  (scalar bias read from SMEM)
    q = jnp.dot(wq_ref[...], h, preferred_element_type=jnp.float32) + bq_ref[0, 0]
    q_ref[...] = q.astype(q_ref.dtype)                                 # (1, TB) lane-dense


def critic_forward(state, action, params, *, tile_b=2048):
    """state: (B, state_dim), action: (B, action_dim) -> q: (B, 1)."""
    B = state.shape[0]
    feat = state.shape[1] + action.shape[1]

    # One fused input stream; transpose is layout plumbing done by XLA.
    sa = jnp.concatenate([state, action], axis=-1).astype(jnp.float32)  # (B, F)

    # Lane-dense batch tiles (multiple of 128); pad the batch to a tile multiple.
    tile_b = min(_round_up(tile_b, 128), _round_up(B, 128))
    b_pad = _round_up(B, tile_b)
    if b_pad != B:
        sa = jnp.pad(sa, ((0, b_pad - B), (0, 0)))
    sa_t = sa.T                                                         # (F, B_pad)

    grid = (b_pad // tile_b,)

    def resident(shape):
        # Full-array block with constant index_map -> stays VMEM-resident.
        return pl.BlockSpec(shape, lambda i: (0, 0))

    q_t = pl.pallas_call(
        critic_kernel,
        out_shape=jax.ShapeDtypeStruct((1, b_pad), jnp.float32),
        grid=grid,
        in_specs=[
            pl.BlockSpec((feat, tile_b), lambda i: (0, i)),   # batch-tiled input
            resident(params["w1"].shape),
            resident(params["b1"].shape),
            resident(params["w2"].shape),
            resident(params["b2"].shape),
            resident(params["w3"].shape),
            resident(params["b3"].shape),
            resident(params["wq"].shape),
            pl.BlockSpec((1, 1), lambda i: (0, 0),
                         memory_space=pltpu.MemorySpace.SMEM),  # scalar q-bias
        ],
        out_specs=pl.BlockSpec((1, tile_b), lambda i: (0, i)),  # lane-dense store
        compiler_params=pltpu.CompilerParams(
            dimension_semantics=("parallel",)),                 # 2-TC shard on v7x
    )(sa_t, params["w1"], params["b1"], params["w2"], params["b2"],
      params["w3"], params["b3"], params["wq"], params["bq"])

    return q_t[0, :B].reshape(B, 1)


def init_params(key, state_dim, action_dim):
    """Torch-default init U(-1/sqrt(fan_in), +); weights kept in torch (out, in)
    layout, with the state/action first layers packed block-diagonally."""
    def linear(k, fan_in, fan_out):
        kw, kb = jax.random.split(k)
        bound = 1.0 / (fan_in ** 0.5)
        w = jax.random.uniform(kw, (fan_out, fan_in), jnp.float32, -bound, bound)
        b = jax.random.uniform(kb, (fan_out, 1), jnp.float32, -bound, bound)
        return w, b

    k1, k2, k3, k4, k5 = jax.random.split(key, 5)
    w_x1, b_x1 = linear(k1, state_dim, 32)
    w_a1, b_a1 = linear(k2, action_dim, 32)
    w_h2, b_h2 = linear(k3, 64, 32)      # acts on cat([x, a], -1)
    w_h3, b_h3 = linear(k4, 32, 16)
    w_q, b_q = linear(k5, 16, 1)

    # Fused first layer: block-diag [[W_x1, 0], [0, W_a1]] -> (64, sd + ad).
    w1 = jnp.zeros((64, state_dim + action_dim), jnp.float32)
    w1 = w1.at[:32, :state_dim].set(w_x1)
    w1 = w1.at[32:, state_dim:].set(w_a1)
    b1 = jnp.concatenate([b_x1, b_a1], axis=0)   # (64, 1)

    return {"w1": w1, "b1": b1, "w2": w_h2, "b2": b_h2,
            "w3": w_h3, "b3": b_h3, "wq": w_q, "bq": b_q}


def critic_ref(state, action, p):
    """Pure-JAX reference matching the PyTorch forward exactly."""
    sd = state.shape[1]
    w_x1, w_a1 = p["w1"][:32, :sd], p["w1"][32:, sd:]
    b_x1, b_a1 = p["b1"][:32, 0], p["b1"][32:, 0]
    x = jnp.maximum(state @ w_x1.T + b_x1, 0.0)
    a = jnp.maximum(action @ w_a1.T + b_a1, 0.0)
    h = jnp.concatenate([x, a], axis=-1)
    h = jnp.maximum(h @ p["w2"].T + p["b2"][:, 0], 0.0)
    h = jnp.maximum(h @ p["w3"].T + p["b3"][:, 0], 0.0)
    return h @ p["wq"].T + p["bq"][:, 0]


if __name__ == "__main__":
    key = jax.random.PRNGKey(0)
    kp, ks, ka = jax.random.split(key, 3)

    batch, state_dim, action_dim = 8, 8, 4
    params = init_params(kp, state_dim, action_dim)
    state = jax.random.normal(ks, (batch, state_dim), jnp.float32)
    action = jax.random.normal(ka, (batch, action_dim), jnp.float32)

    q = jax.block_until_ready(critic_forward(state, action, params))
    q_ref = critic_ref(state, action, params)

    assert q.shape == (batch, 1)
    assert jnp.allclose(q, q_ref, atol=1e-5, rtol=1e-5)

    print("KERNEL_OK")
</pallas_src>

<mosaic_0001>
module attributes {stable_mosaic.version = 11 : i64} {
  func.func @critic_kernel(%arg0: i32, %arg1: memref<12x128xf32, #tpu.memory_space<vmem>>, %arg2: memref<64x12xf32, #tpu.memory_space<vmem>>, %arg3: memref<64x1xf32, #tpu.memory_space<vmem>>, %arg4: memref<32x64xf32, #tpu.memory_space<vmem>>, %arg5: memref<32x1xf32, #tpu.memory_space<vmem>>, %arg6: memref<16x32xf32, #tpu.memory_space<vmem>>, %arg7: memref<16x1xf32, #tpu.memory_space<vmem>>, %arg8: memref<1x16xf32, #tpu.memory_space<vmem>>, %arg9: memref<1x1xf32, #tpu.memory_space<smem>>, %arg10: memref<1x128xf32, #tpu.memory_space<vmem>>) attributes {dimension_semantics = [#tpu.dimension_semantics<parallel>], iteration_bounds = array<i64: 1>, scalar_prefetch = 0 : i64, scratch_operands = 0 : i64, tpu.core_type = #tpu.core_type<tc>, window_params = [{transform_indices = @transform_0, window_bounds = array<i64: 12, 128>}, {pipeline_mode = #tpu.pipeline_mode<synchronous>, transform_indices = @transform_1, window_bounds = array<i64: 64, 12>}, {pipeline_mode = #tpu.pipeline_mode<synchronous>, transform_indices = @transform_2, window_bounds = array<i64: 64, 1>}, {pipeline_mode = #tpu.pipeline_mode<synchronous>, transform_indices = @transform_3, window_bounds = array<i64: 32, 64>}, {pipeline_mode = #tpu.pipeline_mode<synchronous>, transform_indices = @transform_4, window_bounds = array<i64: 32, 1>}, {pipeline_mode = #tpu.pipeline_mode<synchronous>, transform_indices = @transform_5, window_bounds = array<i64: 16, 32>}, {pipeline_mode = #tpu.pipeline_mode<synchronous>, transform_indices = @transform_6, window_bounds = array<i64: 16, 1>}, {pipeline_mode = #tpu.pipeline_mode<synchronous>, transform_indices = @transform_7, window_bounds = array<i64: 1, 16>}, {transform_indices = @transform_8, window_bounds = array<i64: 1, 1>}, {transform_indices = @transform_9, window_bounds = array<i64: 1, 128>}]} {
    %c0 = arith.constant 0 : index
    %c0_0 = arith.constant 0 : index
    %0 = vector.load %arg1[%c0, %c0_0] : memref<12x128xf32, #tpu.memory_space<vmem>>, vector<12x128xf32>
    %c0_1 = arith.constant 0 : index
    %c0_2 = arith.constant 0 : index
    %1 = vector.load %arg2[%c0_1, %c0_2] : memref<64x12xf32, #tpu.memory_space<vmem>>, vector<64x12xf32>
    %cst = arith.constant dense<0.000000e+00> : vector<64x128xf32>
    %2 = tpu.matmul %1, %0, %cst {dimension_numbers = #tpu.dot_dimension_numbers<[1], [0], [0], [1], [0, 0, 1, 1], [], []>} : vector<64x12xf32>, vector<12x128xf32>, vector<64x128xf32> -> vector<64x128xf32>
    %c0_3 = arith.constant 0 : index
    %c0_4 = arith.constant 0 : index
    %3 = vector.load %arg3[%c0_3, %c0_4] : memref<64x1xf32, #tpu.memory_space<vmem>>, vector<64x1xf32>
    %4 = vector.broadcast %3 : vector<64x1xf32> to vector<64x128xf32>
    %5 = arith.addf %2, %4 : vector<64x128xf32>
    %cst_5 = arith.constant 0.000000e+00 : f32
    %6 = vector.broadcast %cst_5 : f32 to vector<64x128xf32>
    %7 = arith.maximumf %5, %6 : vector<64x128xf32>
    %c0_6 = arith.constant 0 : index
    %c0_7 = arith.constant 0 : index
    %8 = vector.load %arg4[%c0_6, %c0_7] : memref<32x64xf32, #tpu.memory_space<vmem>>, vector<32x64xf32>
    %cst_8 = arith.constant dense<0.000000e+00> : vector<32x128xf32>
    %9 = tpu.matmul %8, %7, %cst_8 {dimension_numbers = #tpu.dot_dimension_numbers<[1], [0], [0], [1], [0, 0, 1, 1], [], []>} : vector<32x64xf32>, vector<64x128xf32>, vector<32x128xf32> -> vector<32x128xf32>
    %c0_9 = arith.constant 0 : index
    %c0_10 = arith.constant 0 : index
    %10 = vector.load %arg5[%c0_9, %c0_10] : memref<32x1xf32, #tpu.memory_space<vmem>>, vector<32x1xf32>
    %11 = vector.broadcast %10 : vector<32x1xf32> to vector<32x128xf32>
    %12 = arith.addf %9, %11 : vector<32x128xf32>
    %cst_11 = arith.constant 0.000000e+00 : f32
    %13 = vector.broadcast %cst_11 : f32 to vector<32x128xf32>
    %14 = arith.maximumf %12, %13 : vector<32x128xf32>
    %c0_12 = arith.constant 0 : index
    %c0_13 = arith.constant 0 : index
    %15 = vector.load %arg6[%c0_12, %c0_13] : memref<16x32xf32, #tpu.memory_space<vmem>>, vector<16x32xf32>
    %cst_14 = arith.constant dense<0.000000e+00> : vector<16x128xf32>
    %16 = tpu.matmul %15, %14, %cst_14 {dimension_numbers = #tpu.dot_dimension_numbers<[1], [0], [0], [1], [0, 0, 1, 1], [], []>} : vector<16x32xf32>, vector<32x128xf32>, vector<16x128xf32> -> vector<16x128xf32>
    %c0_15 = arith.constant 0 : index
    %c0_16 = arith.constant 0 : index
    %17 = vector.load %arg7[%c0_15, %c0_16] : memref<16x1xf32, #tpu.memory_space<vmem>>, vector<16x1xf32>
    %18 = vector.broadcast %17 : vector<16x1xf32> to vector<16x128xf32>
    %19 = arith.addf %16, %18 : vector<16x128xf32>
    %cst_17 = arith.constant 0.000000e+00 : f32
    %20 = vector.broadcast %cst_17 : f32 to vector<16x128xf32>
    %21 = arith.maximumf %19, %20 : vector<16x128xf32>
    %c0_18 = arith.constant 0 : index
    %c0_19 = arith.constant 0 : index
    %22 = vector.load %arg8[%c0_18, %c0_19] : memref<1x16xf32, #tpu.memory_space<vmem>>, vector<1x16xf32>
    %cst_20 = arith.constant dense<0.000000e+00> : vector<1x128xf32>
    %23 = tpu.matmul %22, %21, %cst_20 {dimension_numbers = #tpu.dot_dimension_numbers<[1], [0], [0], [1], [0, 0, 1, 1], [], []>} : vector<1x16xf32>, vector<16x128xf32>, vector<1x128xf32> -> vector<1x128xf32>
    %c0_21 = arith.constant 0 : index
    %c0_22 = arith.constant 0 : index
    %24 = memref.load %arg9[%c0_21, %c0_22] : memref<1x1xf32, #tpu.memory_space<smem>>
    %25 = vector.broadcast %24 : f32 to vector<1x128xf32>
    %26 = arith.addf %23, %25 : vector<1x128xf32>
    %c0_23 = arith.constant 0 : index
    %c0_24 = arith.constant 0 : index
    %27 = vector.load %arg10[%c0_23, %c0_24] : memref<1x128xf32, #tpu.memory_space<vmem>>, vector<1x128xf32>
    tpu.vector_store %arg10[%c0_23, %c0_24], %26 {strides = array<i32>} : memref<1x128xf32, #tpu.memory_space<vmem>>, vector<1x128xf32>,
    return
  }
  func.func @transform_0(%arg0: i32) -> (i32, i32) {
    %c0_i32 = arith.constant 0 : i32
    %c0_i32_0 = arith.constant 0 : i32
    return %c0_i32, %arg0 : i32, i32
  }
  func.func @transform_1(%arg0: i32) -> (i32, i32) {
    %c0_i32 = arith.constant 0 : i32
    %c0_i32_0 = arith.constant 0 : i32
    %c0_i32_1 = arith.constant 0 : i32
    return %c0_i32, %c0_i32_0 : i32, i32
  }
  func.func @transform_2(%arg0: i32) -> (i32, i32) {
    %c0_i32 = arith.constant 0 : i32
    %c0_i32_0 = arith.constant 0 : i32
    %c0_i32_1 = arith.constant 0 : i32
    return %c0_i32, %c0_i32_0 : i32, i32
  }
  func.func @transform_3(%arg0: i32) -> (i32, i32) {
    %c0_i32 = arith.constant 0 : i32
    %c0_i32_0 = arith.constant 0 : i32
    %c0_i32_1 = arith.constant 0 : i32
    return %c0_i32, %c0_i32_0 : i32, i32
  }
  func.func @transform_4(%arg0: i32) -> (i32, i32) {
    %c0_i32 = arith.constant 0 : i32
    %c0_i32_0 = arith.constant 0 : i32
    %c0_i32_1 = arith.constant 0 : i32
    return %c0_i32, %c0_i32_0 : i32, i32
  }
  func.func @transform_5(%arg0: i32) -> (i32, i32) {
    %c0_i32 = arith.constant 0 : i32
    %c0_i32_0 = arith.constant 0 : i32
    %c0_i32_1 = arith.constant 0 : i32
    return %c0_i32, %c0_i32_0 : i32, i32
  }
  func.func @transform_6(%arg0: i32) -> (i32, i32) {
    %c0_i32 = arith.constant 0 : i32
    %c0_i32_0 = arith.constant 0 : i32
    %c0_i32_1 = arith.constant 0 : i32
    return %c0_i32, %c0_i32_0 : i32, i32
  }
  func.func @transform_7(%arg0: i32) -> (i32, i32) {
    %c0_i32 = arith.constant 0 : i32
    %c0_i32_0 = arith.constant 0 : i32
    %c0_i32_1 = arith.constant 0 : i32
    return %c0_i32, %c0_i32_0 : i32, i32
  }
  func.func @transform_8(%arg0: i32) -> (i32, i32) {
    %c0_i32 = arith.constant 0 : i32
    %c0_i32_0 = arith.constant 0 : i32
    %c0_i32_1 = arith.constant 0 : i32
    return %c0_i32, %c0_i32_0 : i32, i32
  }
  func.func @transform_9(%arg0: i32) -> (i32, i32) {
    %c0_i32 = arith.constant 0 : i32
    %c0_i32_0 = arith.constant 0 : i32
    return %c0_i32, %arg0 : i32, i32
  }
}

</mosaic_0001>

<bundles_post_ra>
// kernel: tpu_custom_call.1
= control target key start
LH: loop header
LB: loop body
LE: loop exit
PB: predicated region body
PF: predicated region fallthrough
CT: control target
= control target key end

     0   :  { %vm117_vm0 = vcmask 1043456   ;;  %vm92_vm1 = vcmask 97280   ;;  %v685_v4 = vmov 0   ;;  %s852_s0 = inlined_call_operand.vmem [shape: f32[12,128], index: 0, kind: input, shape index: {}]   ;;  %s853_s1 = inlined_call_operand.vmem [shape: f32[64,12], index: 1, kind: input, shape index: {}]   ;;  %s854_s2 = inlined_call_operand.vmem [shape: f32[64,1], index: 2, kind: input, shape index: {}]   ;;  %s855_s3 = inlined_call_operand.vmem [shape: f32[32,64], index: 3, kind: input, shape index: {}]   ;;  %s856_s4 = inlined_call_operand.vmem [shape: f32[32,1], index: 4, kind: input, shape index: {}]   ;;  %s857_s5 = inlined_call_operand.vmem [shape: f32[16,32], index: 5, kind: input, shape index: {}]   ;;  %s858_s6 = inlined_call_operand.vmem [shape: f32[16,1], index: 6, kind: input, shape index: {}]   ;;  %s859_s7 = inlined_call_operand.vmem [shape: f32[1,16], index: 7, kind: input, shape index: {}]   ;;  %s860_s8 = inlined_call_operand.<no memory space> [shape: f32[1,1], index: 8, kind: input, shape index: {}]   ;;  %s861_s9 = inlined_call_operand.hbm [shape: f32[1,128], index: 9, kind: output, shape index: {}]  }
   0x1   :  { %v35_v0 = vld [vmem:[%s852_s0 + $0x8] sm:$0xf]  ;;  %v34_v1 = vld [vmem:[%s852_s0] sm:$0xff]  ;;  %661 = vset.pattern.permute.xlu0 %v685_v4  ;;  %v38_v5 = vld [vmem:[%s853_s1 + $0x10] sm:$0xff]  ;;  %662 = vset.pattern.permute.xlu1 %v685_v4 }
   0x2   :  { %v36_v2 = vld [vmem:[%s853_s1] sm:$0xff]  ;;  %601 = vmatprep.subr.msk.mxu0 %vm117_vm0, %v35_v0  ;;  %v37_v3 = vld [vmem:[%s853_s1 + $0x8] sm:$0xff]  ;;  %v51_v6 = vld [vmem:[%s854_s2 + $0x38] sm:$0xff] }
   0x3   :  { %605 = vmatprep.mubr.msk.f32.mxu0 %vm92_vm1, %v36_v2  ;;  %602 = vmatpush3.msk.msra.mxu0 %vm117_vm0, %v35_v0  ;;  %v49_v7 = vld [vmem:[%s854_s2 + $0x28] sm:$0xff]  ;;  %v50_v8 = vld [vmem:[%s854_s2 + $0x30] sm:$0xff]  ;;  %v39_v9 = vld [vmem:[%s853_s1 + $0x18] sm:$0xff] }
   0x4   :  { %603 = vmatprep.subr.mxu0 %v34_v1  ;;  %89 = vperm.xlu0 %661, %v51_v6   ;;  %v48_v10 = vld [vmem:[%s854_s2 + $0x20] sm:$0xff] }
   0x5   :  { %604 = vmatpush3.msra.mxu0 %v34_v1  ;;  %79 = vperm.xlu1 %662, %v49_v7   ;;  %v40_v11 = vld [vmem:[%s853_s1 + $0x20] sm:$0xff] }
   0x6   :  { %606 = vmatmul.mubr.msk.f32.vlgmr.msra.gmra.mxu0 %vm92_vm1, %v37_v3 }
   0x7   :  { %608 = vmatprep.mubr.msk.f32.mxu0 %vm92_vm1, %v38_v5 }
   0x8   :  { %84 = vperm.xlu0 %661, %v50_v8  }
   0x9   :  { %15 = vsyncpa [#allocation4], 0  ;;  %74 = vperm.xlu1 %662, %v48_v10   ;;  %v47_v12 = vld [vmem:[%s854_s2 + $0x18] sm:$0xff]  ;;  %v41_v13 = vld [vmem:[%s853_s1 + $0x28] sm:$0xff]  ;;  %vm262_vm2 = vcmask 523264   ;;  %vm378_vm3 = vcmask 261120  }
   0xa   :  { %609 = vmatmul.mubr.msk.f32.gmra.mxu0 %vm92_vm1, %v39_v9  ;;  %v46_v14 = vld [vmem:[%s854_s2 + $0x10] sm:$0xff]  ;;  %v45_v16 = vld [vmem:[%s854_s2 + $0x8] sm:$0xff]  ;;  %v43_v17 = vld [vmem:[%s853_s1 + $0x38] sm:$0xff]  ;;  %vm687_vm4 = vmmov 0   ;;  %vm465_vm5 = vcmask 130048   ;;  %s688_s22 = smov [#allocation3]  }
   0xb   :  { %611 = vmatprep.mubr.msk.f32.mxu0 %vm92_vm1, %v40_v11  ;;  %v42_v15 = vld [vmem:[%s853_s1 + $0x30] sm:$0xff]  ;;  %v44_v18 = vld [vmem:[%s854_s2] sm:$0xff]  ;;  %v241_v19 = vld [vmem:[%s856_s4 + $0x18] sm:$0xff]  ;;  %s546_s23 = sshll.u32 %s688_s22, 4  ;;  %s547_s23 = int_to_ptr.vmem [resolvable:$true] %s546_s23 }
   0xc   :  { %69 = vperm.xlu0 %661, %v47_v12   ;;  %v240_v20 = vld [vmem:[%s856_s4 + $0x10] sm:$0xff]  ;;  %v239_v21 = vld [vmem:[%s856_s4 + $0x8] sm:$0xff]  ;;  %v238_v22 = vld [vmem:[%s856_s4] sm:$0xff]  ;;  %s663_s24 = scalar_lea.vmem %s547_s23, 16  ;;  %s667_s25 = scalar_lea.vmem %s547_s23, 32 }
   0xd   :  { %64 = vperm.xlu1 %662, %v46_v14   ;;  %v367_v23 = vld [vmem:[%s858_s6 + $0x8] sm:$0xff]  ;;  %v366_v24 = vld [vmem:[%s858_s6] sm:$0xff]  ;;  %v236_v59 = vld [vmem:[%s855_s3 + $0x10] sm:$0xff]  ;;  %p664_p0 = scmp.ne.s32.totalorder %s547_s23, %s663_s24  ;;  %p668_p1 = scmp.lt.s32.totalorder %s547_s23, %s547_s23 }
   0xe   :  { %612 = vmatmul.mubr.msk.f32.gmra.mxu0 %vm92_vm1, %v41_v13  ;;  %v234_v25 = vld [vmem:[%s855_s3] sm:$0xff]  ;;  %v235_v58 = vld [vmem:[%s855_s3 + $0x8] sm:$0xff]  ;;  %v237_v60 = vld [vmem:[%s855_s3 + $0x18] sm:$0xff]  ;;  %p669_p2 = scmp.lt.s32.totalorder %s667_s25, %s663_s24 }
   0xf   :  { %614 = vmatprep.mubr.msk.f32.mxu0 %vm92_vm1, %v42_v15  ;;  %633 = vmatprep.mubr.msk.f32.mxu1 %vm262_vm2, %v234_v25  ;;  %v364_v61 = vld [vmem:[%s857_s5] sm:$0xff]  ;;  %v365_v14 = vld [vmem:[%s857_s5 + $0x8] sm:$0xff]  ;;  %v686_v15 = vmov 0.0   ;;  %v464_v25 = vstv %s860_s8 }
  0x10   :  { %59 = vperm.xlu0 %661, %v45_v16   ;;  %p670_p3 = por %p669_p2, %p668_p1 }
  0x11   :  { %54 = vperm.xlu1 %662, %v44_v18  }
  0x12   :  { %615 = vmatmul.mubr.msk.f32.gmra.mxu0 %vm92_vm1, %v43_v17  ;;  %p671_p4 = pnand %p670_p3, %p664_p0 }
  0x13   :  { %647 = vmatprep.mubr.msk.f32.mxu0 %vm378_vm3, %v364_v61 }
  0x14   :  { %259 = vperm.xlu0 %661, %v241_v19  }
  0x15   :  { %254 = vperm.xlu1 %662, %v240_v20  }
  0x18   :  { %249 = vperm.xlu0 %661, %v239_v21  }
  0x19   :  { %244 = vperm.xlu1 %662, %v238_v22  }
  0x1c   :  { %375 = vperm.xlu0 %661, %v367_v23  }
  0x1d   :  { %370 = vperm.xlu1 %662, %v366_v24   ;;  %v462_v24 = vld [vmem:[%s859_s7] sm:$0x1] }
  0x7f   :  { %v90_v28 = vpop.permute.xlu0 %89 }
  0x80   :  { %v80_v29 = vpop.permute.xlu1 %79 }
  0x83   :  { %v85_v33 = vpop.permute.xlu0 %84 }
  0x84   :  { %v75_v34 = vpop.permute.xlu1 %74 }
  0x87   :  { %v70_v42 = vpop.permute.xlu0 %69 }
  0x88   :  { %v65_v43 = vpop.permute.xlu1 %64 }
  0x8b   :  { %v60_v50 = vpop.permute.xlu0 %59 }
  0x8c   :  { %v55_v51 = vpop.permute.xlu1 %54 }
  0x8f   :  { %v260_v62 = vpop.permute.xlu0 %259 }
  0x90   :  { %v255_v0 = vpop.permute.xlu1 %254 }
  0x93   :  { %v250_v4 = vpop.permute.xlu0 %249 }
  0x94   :  { %v245_v9 = vpop.permute.xlu1 %244 }
  0x97   :  { %v376_v16 = vpop.permute.xlu0 %375 }
  0x98   :  { %v371_v19 = vpop.permute.xlu1 %370 }
  0xc6   :  { %v607_v26 = vpop.f32.mrf.mxu0 }
  0xc7   :  { %v193_v52 = vadd.f32 %v607_v26, %v60_v50 }
  0xc8   :  { %v187_v27 = vpop.f32.mrf.mxu0 }
  0xc9   :  { %v188_v54 = vadd.f32 %v187_v27, %v55_v51  ;;  %v227_v56 = vmax.f32 %v193_v52, 0.0 }
  0xca   :  { %v610_v30 = vpop.f32.mrf.mxu0 }
  0xcb   :  { %v203_v46 = vadd.f32 %v610_v30, %v70_v42  ;;  %v226_v57 = vmax.f32 %v188_v54, 0.0 }
  0xcc   :  { %v197_v31 = vpop.f32.mrf.mxu0 }
  0xcd   :  { %v198_v48 = vadd.f32 %v197_v31, %v65_v43  ;;  %v229_v53 = vmax.f32 %v203_v46, 0.0 }
  0xce   :  { %v613_v32 = vpop.f32.mrf.mxu0 }
  0xcf   :  { %v213_v39 = vadd.f32 %v613_v32, %v80_v29  ;;  %v228_v55 = vmax.f32 %v198_v48, 0.0 }
  0xd0   :  { %v207_v35 = vpop.f32.mrf.mxu0 }
  0xd1   :  { %v208_v44 = vadd.f32 %v207_v35, %v75_v34  ;;  %v231_v47 = vmax.f32 %v213_v39, 0.0 }
  0xd2   :  { %v616_v36 = vpop.f32.mrf.mxu0 }
  0xd3   :  { %v223_v37 = vadd.f32 %v616_v36, %v90_v28  ;;  %v230_v49 = vmax.f32 %v208_v44, 0.0 }
  0xd4   :  { %v217_v38 = vpop.f32.mrf.mxu0 }
  0xd5   :  { %v233_v40 = vmax.f32 %v223_v37, 0.0  ;;  %v218_v41 = vadd.f32 %v217_v38, %v85_v33 }
  0xd7   :  { %v232_v45 = vmax.f32 %v218_v41, 0.0  ;;  %617 = vmatprep.subr.mxu1 %v233_v40 }
  0xd8   :  { %618 = vmatpush3.msra.mxu1 %v233_v40 }
  0xd9   :  { %619 = vmatprep.subr.mxu1 %v232_v45 }
  0xda   :  { %620 = vmatpush3.msra.mxu1 %v232_v45 }
  0xdb   :  { %621 = vmatprep.subr.mxu1 %v231_v47 }
  0xdc   :  { %622 = vmatpush3.msra.mxu1 %v231_v47 }
  0xdd   :  { %623 = vmatprep.subr.mxu1 %v230_v49 }
  0xde   :  { %624 = vmatpush3.msra.mxu1 %v230_v49 }
  0xdf   :  { %625 = vmatprep.subr.mxu1 %v229_v53 }
  0xe0   :  { %626 = vmatpush3.msra.mxu1 %v229_v53 }
  0xe1   :  { %627 = vmatprep.subr.mxu1 %v228_v55 }
  0xe2   :  { %628 = vmatpush3.msra.mxu1 %v228_v55 }
  0xe3   :  { %629 = vmatprep.subr.mxu1 %v227_v56 }
  0xe4   :  { %630 = vmatpush3.msra.mxu1 %v227_v56 }
  0xe5   :  { %631 = vmatprep.subr.mxu1 %v226_v57 }
  0xe6   :  { %632 = vmatpush3.msra.mxu1 %v226_v57 }
  0xe7   :  { %634 = vmatmul.mubr.msk.f32.vlgmr.msra.gmra.mxu1 %vm262_vm2, %v235_v58 }
  0xe8   :  { %636 = vmatprep.mubr.msk.f32.mxu1 %vm262_vm2, %v236_v59 }
  0xeb   :  { %637 = vmatmul.mubr.msk.f32.gmra.mxu1 %vm262_vm2, %v237_v60 }
 0x1a7   :  { %v635_v63 = vpop.f32.mrf.mxu1 }
 0x1a8   :  { %v347_v6 = vadd.f32 %v635_v63, %v250_v4 }
 0x1a9   :  { %v341_v1 = vpop.f32.mrf.mxu1 }
 0x1aa   :  { %v342_v10 = vadd.f32 %v341_v1, %v245_v9  ;;  %v361_v12 = vmax.f32 %v347_v6, 0.0 }
 0x1ab   :  { %v638_v2 = vpop.f32.mrf.mxu1 }
 0x1ac   :  { %v357_v3 = vadd.f32 %v638_v2, %v260_v62  ;;  %v360_v13 = vmax.f32 %v342_v10, 0.0 }
 0x1ad   :  { %v351_v5 = vpop.f32.mrf.mxu1 }
 0x1ae   :  { %v363_v7 = vmax.f32 %v357_v3, 0.0  ;;  %v352_v8 = vadd.f32 %v351_v5, %v255_v0 }
 0x1b0   :  { %v362_v11 = vmax.f32 %v352_v8, 0.0  ;;  %639 = vmatprep.subr.mxu0 %v363_v7 }
 0x1b1   :  { %640 = vmatpush3.msra.mxu0 %v363_v7 }
 0x1b2   :  { %641 = vmatprep.subr.mxu0 %v362_v11 }
 0x1b3   :  { %642 = vmatpush3.msra.mxu0 %v362_v11 }
 0x1b4   :  { %643 = vmatprep.subr.mxu0 %v361_v12 }
 0x1b5   :  { %644 = vmatpush3.msra.mxu0 %v361_v12 }
 0x1b6   :  { %645 = vmatprep.subr.mxu0 %v360_v13 }
 0x1b7   :  { %646 = vmatpush3.msra.mxu0 %v360_v13 }
 0x1b8   :  { %648 = vmatmul.mubr.msk.f32.vlgmr.msra.gmra.mxu0 %vm378_vm3, %v365_v14  ;;  %650 = vmatprep.subr.mxu0 %v686_v15 }
 0x1b9   :  { %654 = vmatprep.mubr.msk.f32.mxu0 %vm687_vm4, %v686_v15 }
 0x278   :  { %v649_v17 = vpop.f32.mrf.mxu0 }
 0x279   :  { %v457_v18 = vadd.f32 %v649_v17, %v376_v16 }
 0x27a   :  { %v451_v20 = vpop.f32.mrf.mxu0 }
 0x27b   :  { %v461_v21 = vmax.f32 %v457_v18, 0.0  ;;  %v452_v22 = vadd.f32 %v451_v20, %v371_v19 }
 0x27d   :  { %v460_v23 = vmax.f32 %v452_v22, 0.0  ;;  %651 = vmatpush3.msra.mxu0 %v461_v21 }
 0x27e   :  { %652 = vmatprep.subr.mxu0 %v686_v15 }
 0x27f   :  { %653 = vmatpush3.msra.mxu0 %v460_v23 }
 0x280   :  { %655 = vmatmul.mubr.msk.f32.vlgmr.msra.gmra.mxu0 %vm465_vm5, %v462_v24 }
 0x340   :  { %v535_v26 = vpop.f32.mrf.mxu0 }
 0x341   :  { %v536_v27 = vadd.f32 %v535_v26, %v464_v25 }
 0x342   :  { %v656_v28 = vpop.f32.mrf.mxu0 }
 0x343   :  { %539 = vst [vmem:[#allocation3] sm:$0x1] %v536_v27 }
 0x344   :  { %674 = shalt.err (!%p671_p4)
}
 0x345   :  { %549 = dma.vmem_to_hbm [thread:$0]  %s547_s23, 16, %s861_s9, [#allocation4]  }
 0x346   :  { %683 = dma.done.wait [#allocation4], 16  }
 0x347   :  { %684 = vsyncadd [#allocation4], 4294967280 }
 0x348   :  { %553 = vsyncpa [#allocation4], 1 }

</bundles_post_ra>
